<compile_context>
chip_gen: v5e
topology: v5e:2x2
jax: 0.10.0
libtpu: 0.0.40
codegen_flags: <defaults>
</compile_context>

<pallas_src>
import functools

import jax
import jax.numpy as jnp
from jax import lax
from jax.experimental import pallas as pl
from jax.experimental.pallas import tpu as pltpu

_LN_EPS = 1e-5  # PyTorch LayerNorm default


# ----------------------------------------------------------------------------
# Helpers
# ----------------------------------------------------------------------------
def _full_spec(shape):
    nd = len(shape)
    return pl.BlockSpec(shape, lambda i: (0,) * nd)


def _vmem_limit_bytes():
    """~half of physical VMEM: ~64 MiB on v5e/v6e (128 MiB), ~32 MiB on v7x."""
    try:
        cap = pltpu.get_tpu_info().vmem_capacity_bytes
        return int(min(100 * 1024 * 1024, cap // 2))
    except Exception:
        return 32 * 1024 * 1024  # conservative fallback (safe on v7x)


# ----------------------------------------------------------------------------
# Fused GraphNet kernel: edge MLP -> scatter_add -> node MLP -> scatter_mean
#                        -> global MLP, all VMEM-resident, one launch.
# ----------------------------------------------------------------------------
def graphnet_kernel(feats_ref, idx_ref, params_ref, out_ref, *,
                    n_nodes, n_edges, n_graphs, v_in, e_in, u_in,
                    meta, out_lanes):
    N, E, G = n_nodes, n_edges, n_graphs

    feats = feats_ref[...]          # [N+E+G, f_w] f32
    idx = idx_ref[...]              # [4, L]       i32
    p = params_ref[...]             # [P, p_w]     f32

    x = feats[0:N, :v_in]
    ea = feats[N:N + E, :e_in]
    u = feats[N + E:N + E + G, :u_in]

    row = idx[0:1, :E]              # [1, E]
    col = idx[1:2, :E]              # [1, E]
    eix = idx[2:3, :E]              # [1, E]
    vix = idx[3:4, :N]              # [1, N]

    # Scatter-orientation one-hots (index on the lane axis), exact f32 0/1.
    def one_hot(ids_row, n_rows, n_cols):
        i = lax.broadcasted_iota(jnp.int32, (n_rows, n_cols), 0)
        return (i == ids_row).astype(jnp.float32)

    oh_row = one_hot(row, N, E)     # [N, E]: oh_row[n, e] = (row[e] == n)
    oh_col = one_hot(col, N, E)     # [N, E]
    oh_e = one_hot(eix, G, E)       # [G, E]
    oh_v = one_hot(vix, G, N)       # [G, N]

    def fdot(a, b):                 # exact f32 matmul (gather / scatter)
        return jnp.dot(a, b, preferred_element_type=jnp.float32)

    def bdot(a, b):                 # MXU: bf16 operands, f32 accumulation
        return jnp.dot(a.astype(jnp.bfloat16), b.astype(jnp.bfloat16),
                       preferred_element_type=jnp.float32)

    def run_mlp(z, key):
        """Lin -> ReLU -> Lin -> ReLU -> LayerNorm, params sliced from p."""
        off, d_in, d_hid, d_out = meta[key]
        w1 = p[off:off + d_in, :d_hid]
        b1 = p[off + d_in:off + d_in + 1, :d_hid]
        w2 = p[off + d_in + 1:off + d_in + 1 + d_hid, :d_out]
        o2 = off + d_in + 1 + d_hid
        b2 = p[o2:o2 + 1, :d_out]
        gamma = p[o2 + 1:o2 + 2, :d_out]
        beta = p[o2 + 2:o2 + 3, :d_out]
        h = jnp.maximum(bdot(z, w1) + b1, 0.0)
        y = jnp.maximum(bdot(h, w2) + b2, 0.0)
        mean = jnp.mean(y, axis=-1, keepdims=True)
        var = jnp.mean(jnp.square(y - mean), axis=-1, keepdims=True)
        return (y - mean) * lax.rsqrt(var + _LN_EPS) * gamma + beta

    # ---- edge model: edge_mlp(cat([x[row], x[col], ea, u[e_idx]], 1)) ------
    x_src = fdot(oh_row.T, x)       # [E, v_in] == x[row]
    x_dst = fdot(oh_col.T, x)       # [E, v_in] == x[col]
    u_e = fdot(oh_e.T, u)           # [E, u_in] == u[e_indices]
    edge_in = jnp.concatenate([x_src, x_dst, ea, u_e], axis=-1)
    e_new = run_mlp(edge_in, "edge")

    # ---- node model: node_mlp(cat([x, scatter_add(e_new, row), u[v_idx]])) -
    agg = fdot(oh_row, e_new)       # [N, e_out] exact f32 scatter_add
    u_v = fdot(oh_v.T, u)           # [N, u_in] == u[v_indices]
    node_in = jnp.concatenate([x, agg, u_v], axis=-1)
    x_new = run_mlp(node_in, "node")

    # ---- global model: global_mlp(cat([u, mean_v(x_new), mean_e(e_new)])) --
    cnt_v = jnp.sum(oh_v, axis=-1, keepdims=True)      # [G, 1]
    cnt_e = jnp.sum(oh_e, axis=-1, keepdims=True)
    inv_v = pl.reciprocal(jnp.maximum(cnt_v, 1.0), approx=True)  # EUP slot
    inv_e = pl.reciprocal(jnp.maximum(cnt_e, 1.0), approx=True)
    gx = fdot(oh_v, x_new) * inv_v                      # scatter_mean, empty->0
    ge = fdot(oh_e, e_new) * inv_e
    glob_in = jnp.concatenate([u, gx, ge], axis=-1)
    u_new = run_mlp(glob_in, "global")

    # ---- lane-dense packed output slab -------------------------------------
    def pad_lanes(a):
        r, c = a.shape
        if c == out_lanes:
            return a
        return jnp.concatenate(
            [a, jnp.zeros((r, out_lanes - c), jnp.float32)], axis=-1)

    out_ref[0:N, :] = pad_lanes(x_new)
    out_ref[N:N + E, :] = pad_lanes(e_new)
    out_ref[N + E:N + E + G, :] = pad_lanes(u_new)


# ----------------------------------------------------------------------------
# Host-side packing
# ----------------------------------------------------------------------------
def pack_graphnet_params(params):
    """Pack all MLP params into one [P, W] f32 array + static offset metadata.

    Per-MLP row layout: W1 (d_in rows) | b1 (1) | W2 (hidden rows) | b2 (1)
    | gamma (1) | beta (1); rows lane-padded to the common width W.
    """
    width = 0
    for name in ("edge", "node", "global"):
        m = params[name]
        width = max(width, m["w1"].shape[1], m["w2"].shape[1])

    def padw(a):
        a = jnp.asarray(a, jnp.float32)
        if a.ndim == 1:
            a = a[None, :]
        return jnp.pad(a, ((0, 0), (0, width - a.shape[1])))

    rows, meta, off = [], {}, 0
    for name in ("edge", "node", "global"):
        m = params[name]
        d_in, d_hid = m["w1"].shape
        d_out = m["w2"].shape[1]
        rows += [padw(m["w1"]), padw(m["b1"]), padw(m["w2"]),
                 padw(m["b2"]), padw(m["gamma"]), padw(m["beta"])]
        meta[name] = (off, d_in, d_hid, d_out)
        off += d_in + 1 + d_hid + 3
    return jnp.concatenate(rows, axis=0), meta


# ----------------------------------------------------------------------------
# Wrapper: one pallas_call for the whole forward pass
# ----------------------------------------------------------------------------
def graphnet_forward(packed_params, x, edge_index, edge_attr, u,
                     v_indices, e_indices, *, meta):
    N, v_in = x.shape
    E, e_in = edge_attr.shape
    G, u_in = u.shape
    e_out = meta["edge"][3]
    v_out = meta["node"][3]
    u_out = meta["global"][3]

    # features packed on rows (x | edge_attr | u), lane-padded to max width
    f_w = max(v_in, e_in, u_in)
    padf = lambda a: jnp.pad(a.astype(jnp.float32),
                             ((0, 0), (0, f_w - a.shape[1])))
    feats = jnp.concatenate([padf(x), padf(edge_attr), padf(u)], axis=0)

    # index vectors packed into a single [4, L] int32 array (each shipped once)
    L = max(E, N)
    padi = lambda a: jnp.pad(a.astype(jnp.int32), (0, L - a.shape[0]))
    idx = jnp.stack([padi(edge_index[0]), padi(edge_index[1]),
                     padi(e_indices), padi(v_indices)], axis=0)

    out_lanes = -(-max(v_out, e_out, u_out) // 128) * 128
    out_rows = N + E + G
    out_shape = jax.ShapeDtypeStruct((out_rows, out_lanes), jnp.float32)

    kernel = functools.partial(
        graphnet_kernel, n_nodes=N, n_edges=E, n_graphs=G,
        v_in=v_in, e_in=e_in, u_in=u_in, meta=meta, out_lanes=out_lanes)

    inputs = (feats, idx, packed_params)
    slab = pl.pallas_call(
        kernel,
        grid=(1,),
        in_specs=[_full_spec(a.shape) for a in inputs],
        out_specs=_full_spec((out_rows, out_lanes)),
        out_shape=out_shape,
        compiler_params=pltpu.CompilerParams(
            dimension_semantics=("arbitrary",),
            vmem_limit_bytes=_vmem_limit_bytes(),
        ),
    )(*inputs)

    x_new = slab[0:N, :v_out]
    e_new = slab[N:N + E, :e_out]
    u_new = slab[N + E:N + E + G, :u_out]
    return x_new, e_new, u_new


# ----------------------------------------------------------------------------
# Parameter init (deterministic, synthetic)
# ----------------------------------------------------------------------------
def init_mlp_params(key, d_in, hidden, d_out):
    k1, k2, k3, k4 = jax.random.split(key, 4)
    return {
        "w1": jax.random.normal(k1, (d_in, hidden), jnp.float32)
              / jnp.sqrt(float(d_in)),
        "b1": jax.random.normal(k2, (hidden,), jnp.float32) * 0.01,
        "w2": jax.random.normal(k3, (hidden, d_out), jnp.float32)
              / jnp.sqrt(float(hidden)),
        "b2": jax.random.normal(k4, (d_out,), jnp.float32) * 0.01,
        "gamma": jnp.ones((d_out,), jnp.float32),   # LayerNorm weight
        "beta": jnp.zeros((d_out,), jnp.float32),   # LayerNorm bias
    }


def init_graphnet_params(key, in_dims, out_dims, hidden_size=32):
    v_in, e_in, u_in = in_dims
    v_out, e_out, u_out = out_dims
    ke, kn, kg = jax.random.split(key, 3)
    return {
        # edge MLP in = cat([x[row], x[col], edge_attr, u[e_idx]])
        "edge": init_mlp_params(ke, 2 * v_in + e_in + u_in, hidden_size, e_out),
        # node MLP in = cat([x, agg, u[v_idx]])
        "node": init_mlp_params(kn, v_in + e_out + u_in, hidden_size, v_out),
        # global MLP in = cat([u, mean_v(x), mean_e(e)])
        "global": init_mlp_params(kg, u_in + v_out + e_out, hidden_size, u_out),
    }


# ----------------------------------------------------------------------------
# Pure-JAX f32 reference (mirrors the PyTorch forward) for a tolerance check
# ----------------------------------------------------------------------------
def _mlp_ref(z, m):
    h = jnp.maximum(z @ m["w1"] + m["b1"], 0.0)
    y = jnp.maximum(h @ m["w2"] + m["b2"], 0.0)
    mean = jnp.mean(y, axis=-1, keepdims=True)
    var = jnp.mean(jnp.square(y - mean), axis=-1, keepdims=True)
    return (y - mean) / jnp.sqrt(var + _LN_EPS) * m["gamma"] + m["beta"]


def graphnet_reference(params, x, edge_index, edge_attr, u, v_indices, e_indices):
    row, col = edge_index[0], edge_index[1]
    n_nodes, n_graphs = x.shape[0], u.shape[0]

    edge_in = jnp.concatenate([x[row], x[col], edge_attr, u[e_indices]], axis=1)
    e_new = _mlp_ref(edge_in, params["edge"])

    agg = jax.ops.segment_sum(e_new, row, num_segments=n_nodes)
    node_in = jnp.concatenate([x, agg, u[v_indices]], axis=1)
    x_new = _mlp_ref(node_in, params["node"])

    def seg_mean(src, idx, num):
        s = jax.ops.segment_sum(src, idx, num_segments=num)
        c = jax.ops.segment_sum(jnp.ones((src.shape[0],), src.dtype), idx,
                                num_segments=num)
        return s / jnp.maximum(c, 1.0)[:, None]

    glob_in = jnp.concatenate([u, seg_mean(x_new, v_indices, n_graphs),
                               seg_mean(e_new, e_indices, n_graphs)], axis=1)
    u_new = _mlp_ref(glob_in, params["global"])
    return x_new, e_new, u_new


# ----------------------------------------------------------------------------
# Main
# ----------------------------------------------------------------------------
if __name__ == "__main__":
    # Small synthetic graph batch: 2 graphs, 8 nodes each, 16 edges each.
    N_NODES, N_EDGES, N_GRAPHS = 16, 32, 2
    V_IN, E_IN, U_IN = 8, 8, 8
    V_OUT, E_OUT, U_OUT = 16, 16, 16
    HIDDEN = 32

    key = jax.random.PRNGKey(0)
    kx, ke, ku, kr0, kc0, kr1, kc1, kp = jax.random.split(key, 8)

    x = jax.random.normal(kx, (N_NODES, V_IN), jnp.float32)
    edge_attr = jax.random.normal(ke, (N_EDGES, E_IN), jnp.float32)
    u = jax.random.normal(ku, (N_GRAPHS, U_IN), jnp.float32)

    # edges of graph 0 connect nodes [0,8), graph 1 connect nodes [8,16)
    row0 = jax.random.randint(kr0, (N_EDGES // 2,), 0, 8, jnp.int32)
    col0 = jax.random.randint(kc0, (N_EDGES // 2,), 0, 8, jnp.int32)
    row1 = jax.random.randint(kr1, (N_EDGES // 2,), 8, 16, jnp.int32)
    col1 = jax.random.randint(kc1, (N_EDGES // 2,), 8, 16, jnp.int32)
    edge_index = jnp.stack([jnp.concatenate([row0, row1]),
                            jnp.concatenate([col0, col1])], axis=0)

    v_indices = jnp.concatenate([jnp.zeros(8, jnp.int32), jnp.ones(8, jnp.int32)])
    e_indices = jnp.concatenate([jnp.zeros(16, jnp.int32), jnp.ones(16, jnp.int32)])

    # Host-side validity check: out-of-range indices would silently drop
    # contributions in the one-hot formulation (instead of erroring).
    assert int(edge_index.min()) >= 0 and int(edge_index.max()) < N_NODES
    assert int(v_indices.min()) >= 0 and int(v_indices.max()) < N_GRAPHS
    assert int(e_indices.min()) >= 0 and int(e_indices.max()) < N_GRAPHS

    params = init_graphnet_params(kp, (V_IN, E_IN, U_IN),
                                  (V_OUT, E_OUT, U_OUT), hidden_size=HIDDEN)
    # Pack once outside jit (static layout, static offsets).
    packed_params, meta = pack_graphnet_params(params)

    fwd = jax.jit(functools.partial(graphnet_forward, meta=meta))
    x_new, e_new, u_new = fwd(packed_params, x, edge_index, edge_attr, u,
                              v_indices, e_indices)
    jax.block_until_ready((x_new, e_new, u_new))

    assert x_new.shape == (N_NODES, V_OUT)
    assert e_new.shape == (N_EDGES, E_OUT)
    assert u_new.shape == (N_GRAPHS, U_OUT)

    # Tolerance check vs the pure-JAX f32 reference (kernel uses bf16 matmul
    # operands with f32 accumulation inside the MLPs; gathers/scatters are f32).
    x_ref, e_ref, u_ref = graphnet_reference(params, x, edge_index, edge_attr,
                                             u, v_indices, e_indices)
    for got, want in ((x_new, x_ref), (e_new, e_ref), (u_new, u_ref)):
        assert bool(jnp.all(jnp.isfinite(got)))
        assert float(jnp.mean(jnp.abs(got - want))) < 3e-2

    print("KERNEL_OK")
</pallas_src>

<mosaic_0001>
module attributes {stable_mosaic.version = 11 : i64} {
  func.func @graphnet_kernel(%arg0: i32, %arg1: memref<50x8xf32, #tpu.memory_space<vmem>>, %arg2: memref<4x32xi32, #tpu.memory_space<vmem>>, %arg3: memref<212x32xf32, #tpu.memory_space<vmem>>, %arg4: memref<50x128xf32, #tpu.memory_space<vmem>>) attributes {dimension_semantics = [#tpu.dimension_semantics<arbitrary>], iteration_bounds = array<i64: 1>, scalar_prefetch = 0 : i64, scratch_operands = 0 : i64, tpu.core_type = #tpu.core_type<tc>, window_params = [{pipeline_mode = #tpu.pipeline_mode<synchronous>, transform_indices = @transform_0, window_bounds = array<i64: 50, 8>}, {pipeline_mode = #tpu.pipeline_mode<synchronous>, transform_indices = @transform_1, window_bounds = array<i64: 4, 32>}, {pipeline_mode = #tpu.pipeline_mode<synchronous>, transform_indices = @transform_2, window_bounds = array<i64: 212, 32>}, {pipeline_mode = #tpu.pipeline_mode<synchronous>, transform_indices = @transform_3, window_bounds = array<i64: 50, 128>}]} {
    %c0 = arith.constant 0 : index
    %c0_0 = arith.constant 0 : index
    %0 = vector.load %arg1[%c0, %c0_0] : memref<50x8xf32, #tpu.memory_space<vmem>>, vector<50x8xf32>
    %c0_1 = arith.constant 0 : index
    %c0_2 = arith.constant 0 : index
    %1 = vector.load %arg2[%c0_1, %c0_2] : memref<4x32xi32, #tpu.memory_space<vmem>>, vector<4x32xi32>
    %c0_3 = arith.constant 0 : index
    %c0_4 = arith.constant 0 : index
    %2 = vector.load %arg3[%c0_3, %c0_4] : memref<212x32xf32, #tpu.memory_space<vmem>>, vector<212x32xf32>
    %3 = vector.extract_strided_slice %0 {offsets = [0, 0], sizes = [16, 8], strides = [1, 1]} : vector<50x8xf32> to vector<16x8xf32>
    %4 = vector.extract_strided_slice %0 {offsets = [16, 0], sizes = [32, 8], strides = [1, 1]} : vector<50x8xf32> to vector<32x8xf32>
    %5 = vector.extract_strided_slice %0 {offsets = [48, 0], sizes = [2, 8], strides = [1, 1]} : vector<50x8xf32> to vector<2x8xf32>
    %6 = vector.extract_strided_slice %1 {offsets = [0, 0], sizes = [1, 32], strides = [1, 1]} : vector<4x32xi32> to vector<1x32xi32>
    %7 = vector.extract_strided_slice %1 {offsets = [1, 0], sizes = [1, 32], strides = [1, 1]} : vector<4x32xi32> to vector<1x32xi32>
    %8 = vector.extract_strided_slice %1 {offsets = [2, 0], sizes = [1, 32], strides = [1, 1]} : vector<4x32xi32> to vector<1x32xi32>
    %9 = vector.extract_strided_slice %1 {offsets = [3, 0], sizes = [1, 16], strides = [1, 1]} : vector<4x32xi32> to vector<1x16xi32>
    %10 = tpu.iota {dimensions = array<i32: 0>} : vector<16x32xi32>
    %11 = vector.broadcast %6 : vector<1x32xi32> to vector<16x32xi32>
    %12 = arith.cmpi eq, %10, %11 : vector<16x32xi32>
    %13 = arith.extui %12 : vector<16x32xi1> to vector<16x32xi32>
    %14 = arith.sitofp %13 : vector<16x32xi32> to vector<16x32xf32>
    %15 = tpu.iota {dimensions = array<i32: 0>} : vector<16x32xi32>
    %16 = vector.broadcast %7 : vector<1x32xi32> to vector<16x32xi32>
    %17 = arith.cmpi eq, %15, %16 : vector<16x32xi32>
    %18 = arith.extui %17 : vector<16x32xi1> to vector<16x32xi32>
    %19 = arith.sitofp %18 : vector<16x32xi32> to vector<16x32xf32>
    %20 = tpu.iota {dimensions = array<i32: 0>} : vector<2x32xi32>
    %21 = vector.broadcast %8 : vector<1x32xi32> to vector<2x32xi32>
    %22 = arith.cmpi eq, %20, %21 : vector<2x32xi32>
    %23 = arith.extui %22 : vector<2x32xi1> to vector<2x32xi32>
    %24 = arith.sitofp %23 : vector<2x32xi32> to vector<2x32xf32>
    %25 = tpu.iota {dimensions = array<i32: 0>} : vector<2x16xi32>
    %26 = vector.broadcast %9 : vector<1x16xi32> to vector<2x16xi32>
    %27 = arith.cmpi eq, %25, %26 : vector<2x16xi32>
    %28 = arith.extui %27 : vector<2x16xi1> to vector<2x16xi32>
    %29 = arith.sitofp %28 : vector<2x16xi32> to vector<2x16xf32>
    %30 = tpu.transpose %14, [1, 0] : vector<16x32xf32> -> vector<32x16xf32>
    %cst = arith.constant dense<0.000000e+00> : vector<32x8xf32>
    %31 = tpu.matmul %30, %3, %cst {dimension_numbers = #tpu.dot_dimension_numbers<[1], [0], [0], [1], [0, 0, 1, 1], [], []>} : vector<32x16xf32>, vector<16x8xf32>, vector<32x8xf32> -> vector<32x8xf32>
    %32 = tpu.transpose %19, [1, 0] : vector<16x32xf32> -> vector<32x16xf32>
    %cst_5 = arith.constant dense<0.000000e+00> : vector<32x8xf32>
    %33 = tpu.matmul %32, %3, %cst_5 {dimension_numbers = #tpu.dot_dimension_numbers<[1], [0], [0], [1], [0, 0, 1, 1], [], []>} : vector<32x16xf32>, vector<16x8xf32>, vector<32x8xf32> -> vector<32x8xf32>
    %34 = tpu.transpose %24, [1, 0] : vector<2x32xf32> -> vector<32x2xf32>
    %cst_6 = arith.constant dense<0.000000e+00> : vector<32x8xf32>
    %35 = tpu.matmul %34, %5, %cst_6 {dimension_numbers = #tpu.dot_dimension_numbers<[1], [0], [0], [1], [0, 0, 1, 1], [], []>} : vector<32x2xf32>, vector<2x8xf32>, vector<32x8xf32> -> vector<32x8xf32>
    %36 = tpu.concatenate %31, %33, %4, %35 in 1 : vector<32x8xf32>, vector<32x8xf32>, vector<32x8xf32>, vector<32x8xf32> -> vector<32x32xf32>
    %37 = vector.extract_strided_slice %2 {offsets = [0, 0], sizes = [32, 32], strides = [1, 1]} : vector<212x32xf32> to vector<32x32xf32>
    %38 = vector.extract_strided_slice %2 {offsets = [32, 0], sizes = [1, 32], strides = [1, 1]} : vector<212x32xf32> to vector<1x32xf32>
    %39 = vector.extract_strided_slice %2 {offsets = [33, 0], sizes = [32, 16], strides = [1, 1]} : vector<212x32xf32> to vector<32x16xf32>
    %40 = vector.extract_strided_slice %2 {offsets = [65, 0], sizes = [1, 16], strides = [1, 1]} : vector<212x32xf32> to vector<1x16xf32>
    %41 = vector.extract_strided_slice %2 {offsets = [66, 0], sizes = [1, 16], strides = [1, 1]} : vector<212x32xf32> to vector<1x16xf32>
    %42 = vector.extract_strided_slice %2 {offsets = [67, 0], sizes = [1, 16], strides = [1, 1]} : vector<212x32xf32> to vector<1x16xf32>
    %43 = arith.truncf %36 : vector<32x32xf32> to vector<32x32xbf16>
    %44 = arith.truncf %37 : vector<32x32xf32> to vector<32x32xbf16>
    %cst_7 = arith.constant dense<0.000000e+00> : vector<32x32xf32>
    %45 = tpu.matmul %43, %44, %cst_7 {dimension_numbers = #tpu.dot_dimension_numbers<[1], [0], [0], [1], [0, 0, 1, 1], [], []>} : vector<32x32xbf16>, vector<32x32xbf16>, vector<32x32xf32> -> vector<32x32xf32>
    %46 = vector.broadcast %38 : vector<1x32xf32> to vector<32x32xf32>
    %47 = arith.addf %45, %46 : vector<32x32xf32>
    %cst_8 = arith.constant 0.000000e+00 : f32
    %48 = vector.broadcast %cst_8 : f32 to vector<32x32xf32>
    %49 = arith.maximumf %47, %48 : vector<32x32xf32>
    %50 = arith.truncf %49 : vector<32x32xf32> to vector<32x32xbf16>
    %51 = arith.truncf %39 : vector<32x16xf32> to vector<32x16xbf16>
    %cst_9 = arith.constant dense<0.000000e+00> : vector<32x16xf32>
    %52 = tpu.matmul %50, %51, %cst_9 {dimension_numbers = #tpu.dot_dimension_numbers<[1], [0], [0], [1], [0, 0, 1, 1], [], []>} : vector<32x32xbf16>, vector<32x16xbf16>, vector<32x16xf32> -> vector<32x16xf32>
    %53 = vector.broadcast %40 : vector<1x16xf32> to vector<32x16xf32>
    %54 = arith.addf %52, %53 : vector<32x16xf32>
    %cst_10 = arith.constant 0.000000e+00 : f32
    %55 = vector.broadcast %cst_10 : f32 to vector<32x16xf32>
    %56 = arith.maximumf %54, %55 : vector<32x16xf32>
    %cst_11 = arith.constant dense<0.000000e+00> : vector<32xf32>
    %57 = vector.multi_reduction <add>, %56, %cst_11 [1] : vector<32x16xf32> to vector<32xf32>
    %58 = vector.shape_cast %57 : vector<32xf32> to vector<32x1xf32>
    %cst_12 = arith.constant 1.600000e+01 : f32
    %59 = vector.broadcast %cst_12 : f32 to vector<32x1xf32>
    %60 = arith.divf %58, %59 : vector<32x1xf32>
    %61 = vector.broadcast %60 : vector<32x1xf32> to vector<32x16xf32>
    %62 = arith.subf %56, %61 : vector<32x16xf32>
    %63 = arith.mulf %62, %62 : vector<32x16xf32>
    %cst_13 = arith.constant dense<0.000000e+00> : vector<32xf32>
    %64 = vector.multi_reduction <add>, %63, %cst_13 [1] : vector<32x16xf32> to vector<32xf32>
    %65 = vector.shape_cast %64 : vector<32xf32> to vector<32x1xf32>
    %cst_14 = arith.constant 1.600000e+01 : f32
    %66 = vector.broadcast %cst_14 : f32 to vector<32x1xf32>
    %67 = arith.divf %65, %66 : vector<32x1xf32>
    %68 = vector.broadcast %60 : vector<32x1xf32> to vector<32x16xf32>
    %69 = arith.subf %56, %68 : vector<32x16xf32>
    %cst_15 = arith.constant 9.99999974E-6 : f32
    %70 = vector.broadcast %cst_15 : f32 to vector<32x1xf32>
    %71 = arith.addf %67, %70 : vector<32x1xf32>
    %72 = math.rsqrt %71 : vector<32x1xf32>
    %73 = vector.broadcast %72 : vector<32x1xf32> to vector<32x16xf32>
    %74 = arith.mulf %69, %73 : vector<32x16xf32>
    %75 = vector.broadcast %41 : vector<1x16xf32> to vector<32x16xf32>
    %76 = arith.mulf %74, %75 : vector<32x16xf32>
    %77 = vector.broadcast %42 : vector<1x16xf32> to vector<32x16xf32>
    %78 = arith.addf %76, %77 : vector<32x16xf32>
    %cst_16 = arith.constant dense<0.000000e+00> : vector<16x16xf32>
    %79 = tpu.matmul %14, %78, %cst_16 {dimension_numbers = #tpu.dot_dimension_numbers<[1], [0], [0], [1], [0, 0, 1, 1], [], []>} : vector<16x32xf32>, vector<32x16xf32>, vector<16x16xf32> -> vector<16x16xf32>
    %80 = tpu.transpose %29, [1, 0] : vector<2x16xf32> -> vector<16x2xf32>
    %cst_17 = arith.constant dense<0.000000e+00> : vector<16x8xf32>
    %81 = tpu.matmul %80, %5, %cst_17 {dimension_numbers = #tpu.dot_dimension_numbers<[1], [0], [0], [1], [0, 0, 1, 1], [], []>} : vector<16x2xf32>, vector<2x8xf32>, vector<16x8xf32> -> vector<16x8xf32>
    %82 = tpu.concatenate %3, %79, %81 in 1 : vector<16x8xf32>, vector<16x16xf32>, vector<16x8xf32> -> vector<16x32xf32>
    %83 = vector.extract_strided_slice %2 {offsets = [68, 0], sizes = [32, 32], strides = [1, 1]} : vector<212x32xf32> to vector<32x32xf32>
    %84 = vector.extract_strided_slice %2 {offsets = [100, 0], sizes = [1, 32], strides = [1, 1]} : vector<212x32xf32> to vector<1x32xf32>
    %85 = vector.extract_strided_slice %2 {offsets = [101, 0], sizes = [32, 16], strides = [1, 1]} : vector<212x32xf32> to vector<32x16xf32>
    %86 = vector.extract_strided_slice %2 {offsets = [133, 0], sizes = [1, 16], strides = [1, 1]} : vector<212x32xf32> to vector<1x16xf32>
    %87 = vector.extract_strided_slice %2 {offsets = [134, 0], sizes = [1, 16], strides = [1, 1]} : vector<212x32xf32> to vector<1x16xf32>
    %88 = vector.extract_strided_slice %2 {offsets = [135, 0], sizes = [1, 16], strides = [1, 1]} : vector<212x32xf32> to vector<1x16xf32>
    %89 = arith.truncf %82 : vector<16x32xf32> to vector<16x32xbf16>
    %90 = arith.truncf %83 : vector<32x32xf32> to vector<32x32xbf16>
    %cst_18 = arith.constant dense<0.000000e+00> : vector<16x32xf32>
    %91 = tpu.matmul %89, %90, %cst_18 {dimension_numbers = #tpu.dot_dimension_numbers<[1], [0], [0], [1], [0, 0, 1, 1], [], []>} : vector<16x32xbf16>, vector<32x32xbf16>, vector<16x32xf32> -> vector<16x32xf32>
    %92 = vector.broadcast %84 : vector<1x32xf32> to vector<16x32xf32>
    %93 = arith.addf %91, %92 : vector<16x32xf32>
    %cst_19 = arith.constant 0.000000e+00 : f32
    %94 = vector.broadcast %cst_19 : f32 to vector<16x32xf32>
    %95 = arith.maximumf %93, %94 : vector<16x32xf32>
    %96 = arith.truncf %95 : vector<16x32xf32> to vector<16x32xbf16>
    %97 = arith.truncf %85 : vector<32x16xf32> to vector<32x16xbf16>
    %cst_20 = arith.constant dense<0.000000e+00> : vector<16x16xf32>
    %98 = tpu.matmul %96, %97, %cst_20 {dimension_numbers = #tpu.dot_dimension_numbers<[1], [0], [0], [1], [0, 0, 1, 1], [], []>} : vector<16x32xbf16>, vector<32x16xbf16>, vector<16x16xf32> -> vector<16x16xf32>
    %99 = vector.broadcast %86 : vector<1x16xf32> to vector<16x16xf32>
    %100 = arith.addf %98, %99 : vector<16x16xf32>
    %cst_21 = arith.constant 0.000000e+00 : f32
    %101 = vector.broadcast %cst_21 : f32 to vector<16x16xf32>
    %102 = arith.maximumf %100, %101 : vector<16x16xf32>
    %cst_22 = arith.constant dense<0.000000e+00> : vector<16xf32>
    %103 = vector.multi_reduction <add>, %102, %cst_22 [1] : vector<16x16xf32> to vector<16xf32>
    %104 = vector.shape_cast %103 : vector<16xf32> to vector<16x1xf32>
    %cst_23 = arith.constant 1.600000e+01 : f32
    %105 = vector.broadcast %cst_23 : f32 to vector<16x1xf32>
    %106 = arith.divf %104, %105 : vector<16x1xf32>
    %107 = vector.broadcast %106 : vector<16x1xf32> to vector<16x16xf32>
    %108 = arith.subf %102, %107 : vector<16x16xf32>
    %109 = arith.mulf %108, %108 : vector<16x16xf32>
    %cst_24 = arith.constant dense<0.000000e+00> : vector<16xf32>
    %110 = vector.multi_reduction <add>, %109, %cst_24 [1] : vector<16x16xf32> to vector<16xf32>
    %111 = vector.shape_cast %110 : vector<16xf32> to vector<16x1xf32>
    %cst_25 = arith.constant 1.600000e+01 : f32
    %112 = vector.broadcast %cst_25 : f32 to vector<16x1xf32>
    %113 = arith.divf %111, %112 : vector<16x1xf32>
    %114 = vector.broadcast %106 : vector<16x1xf32> to vector<16x16xf32>
    %115 = arith.subf %102, %114 : vector<16x16xf32>
    %cst_26 = arith.constant 9.99999974E-6 : f32
    %116 = vector.broadcast %cst_26 : f32 to vector<16x1xf32>
    %117 = arith.addf %113, %116 : vector<16x1xf32>
    %118 = math.rsqrt %117 : vector<16x1xf32>
    %119 = vector.broadcast %118 : vector<16x1xf32> to vector<16x16xf32>
    %120 = arith.mulf %115, %119 : vector<16x16xf32>
    %121 = vector.broadcast %87 : vector<1x16xf32> to vector<16x16xf32>
    %122 = arith.mulf %120, %121 : vector<16x16xf32>
    %123 = vector.broadcast %88 : vector<1x16xf32> to vector<16x16xf32>
    %124 = arith.addf %122, %123 : vector<16x16xf32>
    %cst_27 = arith.constant dense<0.000000e+00> : vector<2xf32>
    %125 = vector.multi_reduction <add>, %29, %cst_27 [1] : vector<2x16xf32> to vector<2xf32>
    %126 = vector.shape_cast %125 : vector<2xf32> to vector<2x1xf32>
    %cst_28 = arith.constant dense<0.000000e+00> : vector<2xf32>
    %127 = vector.multi_reduction <add>, %24, %cst_28 [1] : vector<2x32xf32> to vector<2xf32>
    %128 = vector.shape_cast %127 : vector<2xf32> to vector<2x1xf32>
    %cst_29 = arith.constant 1.000000e+00 : f32
    %129 = vector.broadcast %cst_29 : f32 to vector<2x1xf32>
    %130 = arith.maximumf %126, %129 : vector<2x1xf32>
    %131 = tpu.reciprocal %130 {approx = true} : vector<2x1xf32> -> vector<2x1xf32>
    %cst_30 = arith.constant 1.000000e+00 : f32
    %132 = vector.broadcast %cst_30 : f32 to vector<2x1xf32>
    %133 = arith.maximumf %128, %132 : vector<2x1xf32>
    %134 = tpu.reciprocal %133 {approx = true} : vector<2x1xf32> -> vector<2x1xf32>
    %cst_31 = arith.constant dense<0.000000e+00> : vector<2x16xf32>
    %135 = tpu.matmul %29, %124, %cst_31 {dimension_numbers = #tpu.dot_dimension_numbers<[1], [0], [0], [1], [0, 0, 1, 1], [], []>} : vector<2x16xf32>, vector<16x16xf32>, vector<2x16xf32> -> vector<2x16xf32>
    %136 = vector.broadcast %131 : vector<2x1xf32> to vector<2x16xf32>
    %137 = arith.mulf %135, %136 : vector<2x16xf32>
    %cst_32 = arith.constant dense<0.000000e+00> : vector<2x16xf32>
    %138 = tpu.matmul %24, %78, %cst_32 {dimension_numbers = #tpu.dot_dimension_numbers<[1], [0], [0], [1], [0, 0, 1, 1], [], []>} : vector<2x32xf32>, vector<32x16xf32>, vector<2x16xf32> -> vector<2x16xf32>
    %139 = vector.broadcast %134 : vector<2x1xf32> to vector<2x16xf32>
    %140 = arith.mulf %138, %139 : vector<2x16xf32>
    %141 = tpu.concatenate %5, %137, %140 in 1 : vector<2x8xf32>, vector<2x16xf32>, vector<2x16xf32> -> vector<2x40xf32>
    %142 = vector.extract_strided_slice %2 {offsets = [136, 0], sizes = [40, 32], strides = [1, 1]} : vector<212x32xf32> to vector<40x32xf32>
    %143 = vector.extract_strided_slice %2 {offsets = [176, 0], sizes = [1, 32], strides = [1, 1]} : vector<212x32xf32> to vector<1x32xf32>
    %144 = vector.extract_strided_slice %2 {offsets = [177, 0], sizes = [32, 16], strides = [1, 1]} : vector<212x32xf32> to vector<32x16xf32>
    %145 = vector.extract_strided_slice %2 {offsets = [209, 0], sizes = [1, 16], strides = [1, 1]} : vector<212x32xf32> to vector<1x16xf32>
    %146 = vector.extract_strided_slice %2 {offsets = [210, 0], sizes = [1, 16], strides = [1, 1]} : vector<212x32xf32> to vector<1x16xf32>
    %147 = vector.extract_strided_slice %2 {offsets = [211, 0], sizes = [1, 16], strides = [1, 1]} : vector<212x32xf32> to vector<1x16xf32>
    %148 = arith.truncf %141 : vector<2x40xf32> to vector<2x40xbf16>
    %149 = arith.truncf %142 : vector<40x32xf32> to vector<40x32xbf16>
    %cst_33 = arith.constant dense<0.000000e+00> : vector<2x32xf32>
    %150 = tpu.matmul %148, %149, %cst_33 {dimension_numbers = #tpu.dot_dimension_numbers<[1], [0], [0], [1], [0, 0, 1, 1], [], []>} : vector<2x40xbf16>, vector<40x32xbf16>, vector<2x32xf32> -> vector<2x32xf32>
    %151 = vector.broadcast %143 : vector<1x32xf32> to vector<2x32xf32>
    %152 = arith.addf %150, %151 : vector<2x32xf32>
    %cst_34 = arith.constant 0.000000e+00 : f32
    %153 = vector.broadcast %cst_34 : f32 to vector<2x32xf32>
    %154 = arith.maximumf %152, %153 : vector<2x32xf32>
    %155 = arith.truncf %154 : vector<2x32xf32> to vector<2x32xbf16>
    %156 = arith.truncf %144 : vector<32x16xf32> to vector<32x16xbf16>
    %cst_35 = arith.constant dense<0.000000e+00> : vector<2x16xf32>
    %157 = tpu.matmul %155, %156, %cst_35 {dimension_numbers = #tpu.dot_dimension_numbers<[1], [0], [0], [1], [0, 0, 1, 1], [], []>} : vector<2x32xbf16>, vector<32x16xbf16>, vector<2x16xf32> -> vector<2x16xf32>
    %158 = vector.broadcast %145 : vector<1x16xf32> to vector<2x16xf32>
    %159 = arith.addf %157, %158 : vector<2x16xf32>
    %cst_36 = arith.constant 0.000000e+00 : f32
    %160 = vector.broadcast %cst_36 : f32 to vector<2x16xf32>
    %161 = arith.maximumf %159, %160 : vector<2x16xf32>
    %cst_37 = arith.constant dense<0.000000e+00> : vector<2xf32>
    %162 = vector.multi_reduction <add>, %161, %cst_37 [1] : vector<2x16xf32> to vector<2xf32>
    %163 = vector.shape_cast %162 : vector<2xf32> to vector<2x1xf32>
    %cst_38 = arith.constant 1.600000e+01 : f32
    %164 = vector.broadcast %cst_38 : f32 to vector<2x1xf32>
    %165 = arith.divf %163, %164 : vector<2x1xf32>
    %166 = vector.broadcast %165 : vector<2x1xf32> to vector<2x16xf32>
    %167 = arith.subf %161, %166 : vector<2x16xf32>
    %168 = arith.mulf %167, %167 : vector<2x16xf32>
    %cst_39 = arith.constant dense<0.000000e+00> : vector<2xf32>
    %169 = vector.multi_reduction <add>, %168, %cst_39 [1] : vector<2x16xf32> to vector<2xf32>
    %170 = vector.shape_cast %169 : vector<2xf32> to vector<2x1xf32>
    %cst_40 = arith.constant 1.600000e+01 : f32
    %171 = vector.broadcast %cst_40 : f32 to vector<2x1xf32>
    %172 = arith.divf %170, %171 : vector<2x1xf32>
    %173 = vector.broadcast %165 : vector<2x1xf32> to vector<2x16xf32>
    %174 = arith.subf %161, %173 : vector<2x16xf32>
    %cst_41 = arith.constant 9.99999974E-6 : f32
    %175 = vector.broadcast %cst_41 : f32 to vector<2x1xf32>
    %176 = arith.addf %172, %175 : vector<2x1xf32>
    %177 = math.rsqrt %176 : vector<2x1xf32>
    %178 = vector.broadcast %177 : vector<2x1xf32> to vector<2x16xf32>
    %179 = arith.mulf %174, %178 : vector<2x16xf32>
    %180 = vector.broadcast %146 : vector<1x16xf32> to vector<2x16xf32>
    %181 = arith.mulf %179, %180 : vector<2x16xf32>
    %182 = vector.broadcast %147 : vector<1x16xf32> to vector<2x16xf32>
    %183 = arith.addf %181, %182 : vector<2x16xf32>
    %cst_42 = arith.constant 0.000000e+00 : f32
    %184 = vector.broadcast %cst_42 : f32 to vector<16x112xf32>
    %185 = tpu.concatenate %124, %184 in 1 : vector<16x16xf32>, vector<16x112xf32> -> vector<16x128xf32>
    %c0_43 = arith.constant 0 : index
    %c0_44 = arith.constant 0 : index
    %186 = vector.load %arg4[%c0_43, %c0_44] : memref<50x128xf32, #tpu.memory_space<vmem>>, vector<16x128xf32>
    tpu.vector_store %arg4[%c0_43, %c0_44], %185 {strides = array<i32>} : memref<50x128xf32, #tpu.memory_space<vmem>>, vector<16x128xf32>,
    %cst_45 = arith.constant 0.000000e+00 : f32
    %187 = vector.broadcast %cst_45 : f32 to vector<32x112xf32>
    %188 = tpu.concatenate %78, %187 in 1 : vector<32x16xf32>, vector<32x112xf32> -> vector<32x128xf32>
    %c16 = arith.constant 16 : index
    %c0_46 = arith.constant 0 : index
    %189 = vector.load %arg4[%c16, %c0_46] : memref<50x128xf32, #tpu.memory_space<vmem>>, vector<32x128xf32>
    tpu.vector_store %arg4[%c16, %c0_46], %188 {strides = array<i32>} : memref<50x128xf32, #tpu.memory_space<vmem>>, vector<32x128xf32>,
    %cst_47 = arith.constant 0.000000e+00 : f32
    %190 = vector.broadcast %cst_47 : f32 to vector<2x112xf32>
    %191 = tpu.concatenate %183, %190 in 1 : vector<2x16xf32>, vector<2x112xf32> -> vector<2x128xf32>
    %c48 = arith.constant 48 : index
    %c0_48 = arith.constant 0 : index
    %192 = vector.load %arg4[%c48, %c0_48] : memref<50x128xf32, #tpu.memory_space<vmem>>, vector<2x128xf32>
    tpu.vector_store %arg4[%c48, %c0_48], %191 {strides = array<i32>} : memref<50x128xf32, #tpu.memory_space<vmem>>, vector<2x128xf32>,
    return
  }
  func.func @transform_0(%arg0: i32) -> (i32, i32) {
    %c0_i32 = arith.constant 0 : i32
    %c0_i32_0 = arith.constant 0 : i32
    %c0_i32_1 = arith.constant 0 : i32
    return %c0_i32, %c0_i32_0 : i32, i32
  }
  func.func @transform_1(%arg0: i32) -> (i32, i32) {
    %c0_i32 = arith.constant 0 : i32
    %c0_i32_0 = arith.constant 0 : i32
    %c0_i32_1 = arith.constant 0 : i32
    return %c0_i32, %c0_i32_0 : i32, i32
  }
  func.func @transform_2(%arg0: i32) -> (i32, i32) {
    %c0_i32 = arith.constant 0 : i32
    %c0_i32_0 = arith.constant 0 : i32
    %c0_i32_1 = arith.constant 0 : i32
    return %c0_i32, %c0_i32_0 : i32, i32
  }
  func.func @transform_3(%arg0: i32) -> (i32, i32) {
    %c0_i32 = arith.constant 0 : i32
    %c0_i32_0 = arith.constant 0 : i32
    %c0_i32_1 = arith.constant 0 : i32
    return %c0_i32, %c0_i32_0 : i32, i32
  }
}

</mosaic_0001>

<bundles_post_ra>
// kernel: graphnet_forward.1
= control target key start
LH: loop header
LB: loop body
LE: loop exit
PB: predicated region body
PF: predicated region fallthrough
CT: control target
= control target key end

     0   :  { %v50_v0 = vlaneseq  ;;  %v1093_v4 = vmov 0.0   ;;  %vm267_vm5 = vcmask 1041408   ;;  %vm254_vm6 = vcmask 15360   ;;  %s1094_s23 = smov 16   ;;  %s1095_s24 = smov 24   ;;  %s1446_s1 = inlined_call_operand.vmem [shape: s32[4,32], index: 1, kind: input, shape index: {}]   ;;  %s1447_s0 = inlined_call_operand.vmem [shape: f32[50,8], index: 0, kind: input, shape index: {}]   ;;  %s1448_s2 = inlined_call_operand.vmem [shape: f32[212,32], index: 2, kind: input, shape index: {}]   ;;  %s1449_s3 = inlined_call_operand.vmem [shape: f32[50,128], index: 3, kind: output, shape index: {}]  }
   0x1   :  { %v1121_v1 = vld [vmem:[%s1446_s1] sm:$0xf]  ;;  %v1149_v13 = vld [vmem:[%s1447_s0 + $0x30] sm:$0x3]  ;;  %v1156_v14 = vld [vmem:[%s1447_s0 + $0x8] sm:$0xff]  ;;  %vm107_vm7 = vcmask 130048  }
   0x2   :  { %v1123_v2 = vshrl.u32 %v50_v0, 7  ;;  %v67_v3 = vperm.slane %v1121_v1, 2  ;;  %v53_v6 = vperm.slane %v1121_v1, 0  ;;  %v60_v10 = vperm.slane %v1121_v1, 1  ;;  %1007 = vmatpush.msk.msra.mxu2 %vm267_vm5, %v1149_v13  ;;  %207 = vmatpush.msra.mxu1 %v1156_v14  ;;  %v1163_v15 = vld [vmem:[%s1447_s0] sm:$0xff]  ;;  %v17_v28 = vld [vmem:[%s1447_s0 + $0x10] sm:$0xff] }
   0x3   :  { %134 = vmatpush.msra.mxu0 %v1156_v14  ;;  %v18_v29 = vld [vmem:[%s1447_s0 + $0x18] sm:$0xff]  ;;  %s1096_s25 = smov 8   ;;  %v19_v37 = vld [vmem:[%s1447_s0 + $0x20] sm:$0xff]  ;;  %v20_v38 = vld [vmem:[%s1447_s0 + $0x28] sm:$0xff]  ;;  %vm348_vm8 = vcmask 64512   ;;  %vm357_vm9 = vcmask 195584  }
   0x4   :  { %vm68_vm0 = vcmp.eq.s32.totalorder %v1123_v2, %v67_v3  ;;  %vm54_vm1 = vcmp.eq.s32.totalorder %v1123_v2, %v53_v6  ;;  %v52_v8 = vadd.s32 8, %v1123_v2  ;;  %vm61_vm3 = vcmp.eq.s32.totalorder %v1123_v2, %v60_v10  ;;  %208 = vmatpush.msra.mxu1 %v1163_v15  ;;  %v25_v46 = vld [vmem:[%s1448_s2 + $0x10] sm:$0xff]  ;;  %v26_v47 = vld [vmem:[%s1448_s2 + $0x18] sm:$0xff]  ;;  %v23_v49 = vld [vmem:[%s1448_s2] sm:$0xff] }
   0x5   :  { %v1128_v5 = vsel %vm68_vm0, 1.0, %v1093_v4  ;;  %v1134_v7 = vsel %vm54_vm1, 1.0, %v1093_v4  ;;  %v995_v11 = vsel %vm61_vm3, 1.0, %v1093_v4  ;;  %135 = vmatpush.msra.mxu0 %v1163_v15  ;;  %v1033_v30 = vpack.i.bf16 %v18_v29, %v17_v28  ;;  %v24_v50 = vld [vmem:[%s1448_s2 + $0x8] sm:$0xff] }
   0x6   :  { %222 = vxpose.xlu0.b32.start.end [1/1] (short) (narrow) %v1128_v5, 32  ;;  %75 = vxpose.xlu1.b32.start [1/2] (short) (narrow) %v1134_v7, 32  ;;  %vm55_vm2 = vcmp.eq.s32.totalorder %v52_v8, %v53_v6  ;;  %vm62_vm4 = vcmp.eq.s32.totalorder %v52_v8, %v60_v10  ;;  %v1048_v39 = vpack.i.bf16 %v20_v38, %v19_v37  ;;  %vm367_vm10 = vcmask 261120  }
   0x7   :  { %v1139_v9 = vsel %vm55_vm2, 1.0, %v1093_v4  ;;  %v996_v12 = vsel %vm62_vm4, 1.0, %v1093_v4  ;;  %1018 = vmatpush.msk.msrb.mxu1 %vm267_vm5, %v1149_v13  ;;  %1034 = vrot.lane.b32.xlu2 %v1033_v30, %s1094_s23  ;;  %v365_v48 = vpack.c.bf16 %v26_v47, %v25_v46  ;;  %v364_v51 = vpack.c.bf16 %v24_v50, %v23_v49 }
   0x8   :  { %vm403_vm11 = vsmask.f32 7424 }
   0x9   :  { %380 = vmatpush.bf16.msra.mxu3 %v365_v48 }
   0xd   :  { %381 = vmatpush.bf16.msra.mxu3 %v364_v51 }
   0xe   :  { %76 = vxpose.xlu1.b32.end [2/2] (short) (narrow) %v1139_v9, 32 }
  0x26   :  { %149 = vxpose.xlu0.b32.start [1/2] (short) (narrow) %v995_v11, 32 }
  0x2e   :  { %150 = vxpose.xlu0.b32.end [2/2] (short) (narrow) %v996_v12, 32 }
  0x61   :  { %v1035_v53 = vpop.permute.xlu2 %1034 }
  0x62   :  { %v1037_v59 = vunpack.i.h.bf16 %v1035_v53  ;;  %v1036_v60 = vunpack.i.l.bf16 %v1035_v53 }
  0xaa   :  { %v238_v16 = vpop.trf.xlu0  ;;  %v91_v20 = vpop.trf.xlu1 }
  0xab   :  { %1008 = vmatmul.msk.f32.vlgmr.msra.gmra.mxu2 %vm254_vm6, %v238_v16  ;;  %999 = vmatmul.msk.f32.vlgmr.msra.gmra.mxu0 %vm107_vm7, %v91_v20 }
  0xb2   :  { %v239_v17 = vpop.trf.xlu0  ;;  %v92_v25 = vpop.trf.xlu1 }
  0xb3   :  { %1009 = vmatmul.msk.f32.gmra.mxu2 %vm254_vm6, %v239_v17  ;;  %1000 = vmatmul.msk.f32.gmra.mxu0 %vm107_vm7, %v92_v25 }
  0xba   :  { %v240_v18 = vpop.trf.xlu0  ;;  %v93_v26 = vpop.trf.xlu1 }
  0xbb   :  { %1010 = vmatmul.msk.f32.gmra.mxu2 %vm254_vm6, %v240_v18  ;;  %1001 = vmatmul.msk.f32.gmra.mxu0 %vm107_vm7, %v93_v26 }
  0xc2   :  { %v241_v19 = vpop.trf.xlu0  ;;  %v94_v27 = vpop.trf.xlu1 }
  0xc3   :  { %1011 = vmatmul.msk.f32.gmra.mxu2 %vm254_vm6, %v241_v19  ;;  %1002 = vmatmul.msk.f32.gmra.mxu0 %vm107_vm7, %v94_v27 }
  0xca   :  { %v165_v21 = vpop.trf.xlu0 }
  0xcb   :  { %1003 = vmatmul.msk.f32.vlgmr.msra.gmra.mxu1 %vm107_vm7, %v165_v21 }
  0xd2   :  { %v166_v22 = vpop.trf.xlu0 }
  0xd3   :  { %1004 = vmatmul.msk.f32.gmra.mxu1 %vm107_vm7, %v166_v22 }
  0xda   :  { %v167_v23 = vpop.trf.xlu0 }
  0xdb   :  { %1005 = vmatmul.msk.f32.gmra.mxu1 %vm107_vm7, %v167_v23 }
  0xe2   :  { %v168_v24 = vpop.trf.xlu0 }
  0xe3   :  { %1006 = vmatmul.msk.f32.gmra.mxu1 %vm107_vm7, %v168_v24 }
 0x128   :  { %v137_v52 = vpop.f32.mrf.mxu0 }
 0x12e   :  { %v288_v31 = vpop.f32.mrf.mxu2 }
 0x130   :  { %v140_v54 = vpop.f32.mrf.mxu0 }
 0x136   :  { %v291_v32 = vpop.f32.mrf.mxu2 }
 0x137   :  { %v1038_v33 = vpack.i.bf16 %v291_v32, %v288_v31 }
 0x138   :  { %v143_v16 = vpop.f32.mrf.mxu0 }
 0x139   :  { %1039 = vrot.lane.b32.xlu1 %v1038_v33, %s1095_s24  ;;  %v29_v33 = vld [vmem:[%s1448_s2 + $0x30] sm:$0xff] }
 0x13e   :  { %v294_v41 = vpop.f32.mrf.mxu2 }
 0x140   :  { %v146_v20 = vpop.f32.mrf.mxu0 }
 0x146   :  { %v297_v44 = vpop.f32.mrf.mxu2 }
 0x147   :  { %v1058_v45 = vpack.i.bf16 %v297_v44, %v294_v41 }
 0x148   :  { %v210_v34 = vpop.f32.mrf.mxu1 }
 0x150   :  { %v213_v35 = vpop.f32.mrf.mxu1 }
 0x151   :  { %v1043_v36 = vpack.i.bf16 %v213_v35, %v210_v34  ;;  %v30_v34 = vld [vmem:[%s1448_s2 + $0x38] sm:$0xff] }
 0x152   :  { %v400_v35 = vpack.c.bf16 %v30_v34, %v29_v33 }
 0x153   :  { %1044 = vrot.lane.b32.xlu2 %v1043_v36, %s1096_s25  ;;  %v1232_v36 = vld [vmem:[%s1448_s2 + $0x40] sm:$0xff] }
 0x154   :  { %v401_v37 = vpack.c.bf16 %v1232_v36, %v1232_v36  ;;  %v412_v38 = vshll.u32 %v400_v35, 16 }
 0x156   :  { %v414_v41 = vrot.slane %v412_v38, 1 }
 0x158   :  { %v216_v40 = vpop.f32.mrf.mxu1 }
 0x15b   :  { %1049 = vrot.lane.b32.xlu2 %v1048_v39, %s1094_s23  ;;  %v27_v39 = vld [vmem:[%s1448_s2 + $0x20] sm:$0xff] }
 0x160   :  { %v219_v42 = vpop.f32.mrf.mxu1 }
 0x161   :  { %v1053_v43 = vpack.i.bf16 %v219_v42, %v216_v40  ;;  %v28_v40 = vld [vmem:[%s1448_s2 + $0x28] sm:$0xff]  ;;  %v416_v42 = vshrl.u32 %v400_v35, 16 }
 0x162   :  { %v399_v44 = vpack.c.bf16 %v28_v40, %v27_v39 }
 0x163   :  { %1054 = vrot.lane.b32.xlu2 %v1053_v43, %s1096_s25  ;;  %v420_v43 = vshll.u32 %v401_v37, 16 }
 0x164   :  { %v407_v47 = vshll.u32 %v399_v44, 16  ;;  %v405_v49 = vshrl.u32 %v399_v44, 16 }
 0x165   :  { %v422_v46 = vrot.slane %v420_v43, 1 }
 0x166   :  { %v409_v50 = vrot.slane %v407_v47, 1 }
 0x168   :  { %v410_v51 = vor.u32 %v409_v50, %v405_v49 }
 0x16b   :  { %1059 = vrot.lane.b32.xlu2 %v1058_v45, %s1095_s24  ;;  %v418_v45 = vor.u32 %v416_v42, %v414_v41 }
 0x16d   :  { %v423_v48 = vsel %vm403_vm11, %v418_v45, %v422_v46 }
 0x16e   :  { %438 = vmatpush.bf16.msrb.mxu2 %v423_v48 }
 0x1ab   :  { %v1040_v55 = vpop.permute.xlu1 %1039 }
 0x1ac   :  { %v1042_v61 = vunpack.i.h.bf16 %v1040_v55  ;;  %v1041_v62 = vunpack.i.l.bf16 %v1040_v55 }
 0x1ad   :  { %v1045_v56 = vpop.permute.xlu2 %1044 }
 0x1ae   :  { %v1047_v57 = vunpack.i.h.bf16 %v1045_v56  ;;  %v1046_v58 = vunpack.i.l.bf16 %v1045_v56 }
 0x1b0   :  { %v349_v63 = vsel %vm348_vm8, %v137_v52, %v1046_v58  ;;  %v350_v0 = vsel %vm348_vm8, %v140_v54, %v1047_v57  ;;  %v415_v52 = vsel %vm403_vm11, %v410_v51, %v414_v41  ;;  %v366_v54 = vperm.slane %v27_v39, 0 }
 0x1b1   :  { %v354_v3 = vsel %vm107_vm7, %v350_v0, %v1037_v59  ;;  %v353_v6 = vsel %vm107_vm7, %v349_v63, %v1036_v60  ;;  %439 = vmatpush.bf16.msrb.mxu2 %v415_v52 }
 0x1b2   :  { %v358_v8 = vsel %vm357_vm9, %v353_v6, %v1041_v62  ;;  %v359_v10 = vsel %vm357_vm9, %v354_v3, %v1042_v61 }
 0x1b3   :  { %v362_v11 = vpack.c.bf16 %v359_v10, %v358_v8 }
 0x1b5   :  { %v1050_v12 = vpop.permute.xlu2 %1049  ;;  %1012 = vmatmul.msk.bf16.vlgmr.msra.gmra.mxu3 %vm367_vm10, %v362_v11  ;;  %1027 = vmatpush.msk.msra.mxu2 %vm267_vm5, %v1149_v13  ;;  %v402_v11 = vperm.slane %v1232_v36, 1 }
 0x1b6   :  { %v1052_v23 = vunpack.i.h.bf16 %v1050_v12  ;;  %v1051_v24 = vunpack.i.l.bf16 %v1050_v12 }
 0x1bd   :  { %v1055_v17 = vpop.permute.xlu2 %1054 }
 0x1be   :  { %v1057_v18 = vunpack.i.h.bf16 %v1055_v17  ;;  %v1056_v19 = vunpack.i.l.bf16 %v1055_v17 }
 0x1c0   :  { %v351_v21 = vsel %vm348_vm8, %v143_v16, %v1056_v19  ;;  %v352_v22 = vsel %vm348_vm8, %v146_v20, %v1057_v18 }
 0x1c1   :  { %v356_v28 = vsel %vm107_vm7, %v352_v22, %v1052_v23  ;;  %v355_v29 = vsel %vm107_vm7, %v351_v21, %v1051_v24 }
 0x1c5   :  { %v1060_v25 = vpop.permute.xlu2 %1059 }
 0x1c6   :  { %v1062_v26 = vunpack.i.h.bf16 %v1060_v25  ;;  %v1061_v27 = vunpack.i.l.bf16 %v1060_v25 }
 0x1c8   :  { %v360_v30 = vsel %vm357_vm9, %v355_v29, %v1061_v27  ;;  %v361_v31 = vsel %vm357_vm9, %v356_v28, %v1062_v26 }
 0x1c9   :  { %v363_v32 = vpack.c.bf16 %v361_v31, %v360_v30  ;;  %v71_v30 = vperm.slane %v1121_v1, 3  ;;  %v1097_v31 = vmov 16.0  }
 0x1ca   :  { %1073 = vrcp.f32 %v1097_v31 }
 0x1cb   :  { %1013 = vmatmul.msk.bf16.gmra.mxu3 %vm367_vm10, %v363_v32  ;;  %vm72_vm12 = vcmp.eq.s32.totalorder %v1123_v2, %v71_v30 }
 0x1cc   :  { %v1256_v32 = vsel %vm72_vm12, 1.0, %v1093_v4 }
 0x1cd   :  { %589 = vxpose.xlu1.b32.start.end [1/1] (short) (narrow) %v1256_v32, 16 }
 0x1d0   :  { %v1074_v33 = vpop.eup %1073 }
 0x1d1   :  { %v468_v34 = vmul.f32 16.0, %v1074_v33  ;;  %vm472_vm13 = vweird.f32 %v1074_v33 }
 0x1d3   :  { %v469_v35 = vsub.f32 1.0, %v468_v34 }
 0x1d5   :  { %v470_v37 = vmul.f32 %v1074_v33, %v469_v35 }
 0x1d7   :  { %v471_v38 = vadd.f32 %v1074_v33, %v470_v37 }
 0x1d9   :  { %v1259_v39 = vsel %vm472_vm13, %v1074_v33, %v471_v38 }
 0x238   :  { %v383_v53 = vpop.f32.mrf.mxu3 }
 0x239   :  { %v384_v55 = vadd.f32 %v383_v53, %v366_v54 }
 0x23b   :  { %v393_v58 = vmax.f32 %v384_v55, 0.0 }
 0x240   :  { %v385_v56 = vpop.f32.mrf.mxu3 }
 0x241   :  { %v386_v57 = vadd.f32 %v385_v56, %v366_v54 }
 0x243   :  { %v394_v59 = vmax.f32 %v386_v57, 0.0 }
 0x245   :  { %v397_v60 = vpack.c.bf16 %v394_v59, %v393_v58 }
 0x247   :  { %1014 = vmatmul.msk.bf16.vlgmr.msrb.gmra.mxu2 %vm367_vm10, %v397_v60 }
 0x24e   :  { %v388_v61 = vpop.f32.mrf.mxu3 }
 0x24f   :  { %v389_v62 = vadd.f32 %v388_v61, %v366_v54 }
 0x251   :  { %v395_v3 = vmax.f32 %v389_v62, 0.0 }
 0x256   :  { %v390_v63 = vpop.f32.mrf.mxu3 }
 0x257   :  { %v391_v0 = vadd.f32 %v390_v63, %v366_v54 }
 0x259   :  { %v396_v6 = vmax.f32 %v391_v0, 0.0 }
 0x25b   :  { %v398_v8 = vpack.c.bf16 %v396_v6, %v395_v3 }
 0x25d   :  { %1015 = vmatmul.msk.bf16.gmra.mxu2 %vm367_vm10, %v398_v8 }
 0x271   :  { %v605_v6 = vpop.trf.xlu1 }
 0x272   :  { %1019 = vmatmul.msk.f32.vlgmr.msrb.gmra.mxu1 %vm254_vm6, %v605_v6 }
 0x2ca   :  { %v441_v10 = vpop.f32.mrf.mxu2 }
 0x2cb   :  { %v442_v26 = vadd.f32 %v441_v10, %v402_v11 }
 0x2cd   :  { %v451_v28 = vmax.f32 %v442_v26, 0.0 }
 0x2cf   :  { %v455_v29 = vsel %vm107_vm7, %v451_v28, 0.0 }
 0x2d2   :  { %v443_v12 = vpop.f32.mrf.mxu2 }
 0x2d3   :  { %v444_v16 = vadd.f32 %v443_v12, %v402_v11  ;;  %v1285_v12 = vperm.slane %v1232_v36, 2 }
 0x2d5   :  { %v452_v17 = vmax.f32 %v444_v16, 0.0 }
 0x2d7   :  { %v458_v18 = vsel %vm107_vm7, %v452_v17, 0.0 }
 0x2d8   :  { %459 = vadd.xlane.f32.xlu2 %v458_v18 }
 0x2e0   :  { %v446_v19 = vpop.f32.mrf.mxu2 }
 0x2e1   :  { %v447_v20 = vadd.f32 %v446_v19, %v402_v11  ;;  %v1289_v19 = vperm.slane %v1232_v36, 3 }
 0x2e3   :  { %v453_v21 = vmax.f32 %v447_v20, 0.0 }
 0x2e5   :  { %v461_v22 = vsel %vm107_vm7, %v453_v21, 0.0 }
 0x2e6   :  { %462 = vadd.xlane.f32.xlu0 %v461_v22 }
 0x2e8   :  { %v448_v23 = vpop.f32.mrf.mxu2 }
 0x2e9   :  { %v449_v24 = vadd.f32 %v448_v23, %v402_v11 }
 0x2eb   :  { %v454_v25 = vmax.f32 %v449_v24, 0.0 }
 0x2ed   :  { %v464_v27 = vsel %vm107_vm7, %v454_v25, 0.0 }
 0x2ee   :  { %465 = vadd.xlane.f32.xlu2 %v464_v27 }
 0x2f6   :  { %456 = vadd.xlane.f32.xlu2 %v455_v29 }
 0x34b   :  { %v460_v40 = vpop.xlane.xlu2 %459 }
 0x34c   :  { %v475_v1 = vmul.f32 %v1259_v39, %v460_v40 }
 0x34e   :  { %v479_v41 = vsub.f32 %v452_v17, %v475_v1 }
 0x350   :  { %v483_v2 = vmul.f32 %v479_v41, %v479_v41 }
 0x352   :  { %v489_v42 = vsel %vm107_vm7, %v483_v2, 0.0  ;;  %v37_v2 = vld [vmem:[%s1448_s2 + $0x70] sm:$0xff] }
 0x353   :  { %490 = vadd.xlane.f32.xlu2 %v489_v42  ;;  %v38_v42 = vld [vmem:[%s1448_s2 + $0x78] sm:$0xff] }
 0x359   :  { %v463_v4 = vpop.xlane.xlu0 %462 }
 0x35a   :  { %v476_v43 = vmul.f32 %v1259_v39, %v463_v4 }
 0x35c   :  { %v1264_v44 = vsub.f32 %v453_v21, %v476_v43  ;;  %v606_v21 = vpop.trf.xlu1  ;;  %v1312_v43 = vld [vmem:[%s1448_s2 + $0x80] sm:$0xff] }
 0x35d   :  { %1020 = vmatmul.msk.f32.vlgmr.msra.gmra.mxu2 %vm254_vm6, %v606_v21 }
 0x35e   :  { %v484_v45 = vmul.f32 %v1264_v44, %v1264_v44 }
 0x360   :  { %v492_v46 = vsel %vm107_vm7, %v484_v45, 0.0 }
 0x361   :  { %v466_v47 = vpop.xlane.xlu2 %465  ;;  %493 = vadd.xlane.f32.xlu2 %v492_v46 }
 0x362   :  { %v477_v48 = vmul.f32 %v1259_v39, %v466_v47  ;;  %v707_v47 = vpack.c.bf16 %v38_v42, %v37_v2 }
 0x364   :  { %v1270_v49 = vsub.f32 %v454_v25, %v477_v48 }
 0x366   :  { %v485_v50 = vmul.f32 %v1270_v49, %v1270_v49 }
 0x368   :  { %v495_v51 = vsel %vm107_vm7, %v485_v50, 0.0  ;;  %v708_v50 = vpack.c.bf16 %v1312_v43, %v1312_v43 }
 0x369   :  { %v457_v52 = vpop.xlane.xlu2 %456  ;;  %496 = vadd.xlane.f32.xlu2 %v495_v51 }
 0x36a   :  { %v474_v53 = vmul.f32 %v1259_v39, %v457_v52 }
 0x36c   :  { %v1276_v54 = vsub.f32 %v451_v28, %v474_v53 }
 0x36e   :  { %v482_v55 = vmul.f32 %v1276_v54, %v1276_v54 }
 0x370   :  { %v486_v56 = vsel %vm107_vm7, %v482_v55, 0.0  ;;  %v1322_v55 = vld [vmem:[%s1448_s2 + $0x60] sm:$0xff] }
 0x371   :  { %487 = vadd.xlane.f32.xlu2 %v486_v56  ;;  %v36_v56 = vld [vmem:[%s1448_s2 + $0x68] sm:$0xff] }
 0x3c6   :  { %v491_v57 = vpop.xlane.xlu2 %490 }
 0x3c7   :  { %v499_v58 = vmul.f32 %v491_v57, %v1259_v39 }
 0x3c9   :  { %v503_v59 = vadd.f32 1e-05, %v499_v58 }
 0x3cb   :  { %1075 = vrsqrt.f32 %v503_v59  ;;  %vm522_vm15 = vweird.f32 %v503_v59 }
 0x3d1   :  { %v1076_v60 = vpop.eup %1075 }
 0x3d2   :  { %v517_v61 = vmul.f32 %v1076_v60, %v503_v59  ;;  %vm523_vm14 = vweird.f32 %v1076_v60  ;;  %v720_v59 = vshrl.u32 %v707_v47, 16 }
 0x3d3   :  { %vm524_vm0 = vmor %vm522_vm15, %vm523_vm14  ;;  %vm710_vm15 = vsmask.f32 5376 }
 0x3d4   :  { %v518_v62 = vmul.f32 %v1076_v60, %v517_v61  ;;  %v494_v63 = vpop.xlane.xlu2 %493  ;;  %v723_v61 = vshll.u32 %v707_v47, 16 }
 0x3d5   :  { %v500_v0 = vmul.f32 %v494_v63, %v1259_v39  ;;  %v732_v63 = vshll.u32 %v708_v50, 16 }
 0x3d6   :  { %v519_v3 = vmul.f32 0.5, %v518_v62  ;;  %v729_v62 = vshrl.u32 %v708_v50, 16 }
 0x3d7   :  { %v504_v8 = vadd.f32 1e-05, %v500_v0 }
 0x3d8   :  { %v520_v10 = vsub.f32 1.5, %v519_v3  ;;  %v706_v3 = vpack.c.bf16 %v36_v56, %v1322_v55 }
 0x3d9   :  { %1077 = vrsqrt.f32 %v504_v8  ;;  %vm532_vm2 = vweird.f32 %v504_v8 }
 0x3da   :  { %v521_v11 = vmul.f32 %v1076_v60, %v520_v10  ;;  %v722_v10 = vrot.slane %v720_v59, 2  ;;  %v712_v21 = vshrl.u32 %v706_v3, 16 }
 0x3dc   :  { %v525_v16 = vsel %vm524_vm0, %v1076_v60, %v521_v11  ;;  %v497_v17 = vpop.xlane.xlu2 %496  ;;  %vm678_vm0 = vcmask 1045504  }
 0x3dd   :  { %v501_v18 = vmul.f32 %v497_v17, %v1259_v39  ;;  %v547_v20 = vmul.f32 %v525_v16, %v479_v41  ;;  %v725_v16 = vrot.slane %v723_v61, 3  ;;  %v731_v17 = vrot.slane %v729_v62, 2 }
 0x3de   :  { %v674_v62 = vperm.slane %v1322_v55, 4 }
 0x3df   :  { %v1078_v22 = vpop.eup %1077  ;;  %v505_v23 = vadd.f32 1e-05, %v501_v18  ;;  %v552_v24 = vmul.f32 %v1285_v12, %v547_v20  ;;  %v734_v18 = vrot.slane %v732_v63, 3 }
 0x3e0   :  { %v527_v25 = vmul.f32 %v1078_v22, %v504_v8  ;;  %vm533_vm1 = vweird.f32 %v1078_v22 }
 0x3e1   :  { %1079 = vrsqrt.f32 %v505_v23  ;;  %v1294_v26 = vadd.f32 %v1289_v19, %v552_v24  ;;  %vm534_vm3 = vmor %vm532_vm2, %vm533_vm1  ;;  %vm542_vm5 = vweird.f32 %v505_v23  ;;  %vm808_vm1 = vcmask 123904  }
 0x3e2   :  { %v528_v27 = vmul.f32 %v1078_v22, %v527_v25  ;;  %v726_v25 = vor.u32 %v725_v16, %v722_v10  ;;  %vm812_vm2 = vcmask 254976  }
 0x3e3   :  { %v980_v28 = vsel %vm107_vm7, %v1294_v26, 0.0 }
 0x3e4   :  { %v529_v29 = vmul.f32 0.5, %v528_v27  ;;  %v488_v30 = vpop.xlane.xlu2 %487  ;;  %984 = vst [vmem:[%s1449_s3 + $0x18] sm:$0xff] %v980_v28  ;;  %v735_v27 = vor.u32 %v734_v18, %v731_v17  ;;  %v714_v28 = vrot.slane %v712_v21, 2 }
 0x3e5   :  { %v498_v31 = vmul.f32 %v488_v30, %v1259_v39 }
 0x3e6   :  { %v530_v33 = vsub.f32 1.5, %v529_v29 }
 0x3e7   :  { %v1080_v34 = vpop.eup %1079  ;;  %v502_v35 = vadd.f32 1e-05, %v498_v31 }
 0x3e8   :  { %v531_v37 = vmul.f32 %v1078_v22, %v530_v33  ;;  %v537_v38 = vmul.f32 %v1080_v34, %v505_v23  ;;  %vm543_vm4 = vweird.f32 %v1080_v34  ;;  %v736_v33 = vsel %vm710_vm15, %v726_v25, %v735_v27 }
 0x3e9   :  { %1081 = vrsqrt.f32 %v502_v35  ;;  %vm544_vm6 = vmor %vm542_vm5, %vm543_vm4  ;;  %vm512_vm13 = vweird.f32 %v502_v35 }
 0x3ea   :  { %v535_v40 = vsel %vm534_vm3, %v1078_v22, %v531_v37  ;;  %v538_v1 = vmul.f32 %v1080_v34, %v537_v38  ;;  %v644_v38 = vpop.f32.mrf.mxu1 }
 0x3eb   :  { %v548_v41 = vmul.f32 %v535_v40, %v1264_v44  ;;  %v647_v40 = vpop.f32.mrf.mxu2 }
 0x3ec   :  { %v539_v4 = vmul.f32 0.5, %v538_v1  ;;  %v1068_v1 = vpack.i.bf16 %v647_v40, %v644_v38 }
 0x3ed   :  { %v553_v45 = vmul.f32 %v1285_v12, %v548_v41  ;;  %v673_v41 = vpack.c.bf16 %v1322_v55, %v1322_v55 }
 0x3ee   :  { %v540_v46 = vsub.f32 1.5, %v539_v4  ;;  %v32_v4 = vld [vmem:[%s1448_s2 + $0x48] sm:$0xff] }
 0x3ef   :  { %v1082_v44 = vpop.eup %1081  ;;  %v558_v48 = vadd.f32 %v1289_v19, %v553_v45  ;;  %v682_v42 = vrot.slane %v673_v41, 2 }
 0x3f0   :  { %v541_v51 = vmul.f32 %v1080_v34, %v540_v46  ;;  %v507_v52 = vmul.f32 %v1082_v44, %v502_v35  ;;  %vm513_vm12 = vweird.f32 %v1082_v44  ;;  %v671_v46 = vpack.c.bf16 %v32_v4, %v1232_v36 }
 0x3f1   :  { %v981_v53 = vsel %vm107_vm7, %v558_v48, 0.0  ;;  %vm514_vm14 = vmor %vm512_vm13, %vm513_vm12 }
 0x3f2   :  { %v545_v57 = vsel %vm544_vm6, %v1080_v34, %v541_v51  ;;  %v508_v58 = vmul.f32 %v1082_v44, %v507_v52  ;;  %985 = vst [vmem:[%s1449_s3 + $0x20] sm:$0xff] %v981_v53  ;;  %v679_v47 = vrot.slane %v671_v46, 2 }
 0x3f3   :  { %v549_v60 = vmul.f32 %v545_v57, %v1270_v49  ;;  %v715_v49 = vshll.u32 %v706_v3, 16 }
 0x3f4   :  { %v509_v0 = vmul.f32 0.5, %v508_v58 }
 0x3f5   :  { %v554_v6 = vmul.f32 %v1285_v12, %v549_v60  ;;  %v717_v29 = vrot.slane %v715_v49, 3 }
 0x3f6   :  { %v510_v8 = vsub.f32 1.5, %v509_v0 }
 0x3f7   :  { %v559_v11 = vadd.f32 %v1289_v19, %v554_v6  ;;  %v718_v34 = vor.u32 %v717_v29, %v714_v28 }
 0x3f8   :  { %v511_v20 = vmul.f32 %v1082_v44, %v510_v8 }
 0x3f9   :  { %578 = vmatpush.msrb.mxu0 %v559_v11  ;;  %v982_v22 = vsel %vm107_vm7, %v559_v11, 0.0 }
 0x3fa   :  { %v515_v23 = vsel %vm514_vm14, %v1082_v44, %v511_v20  ;;  %986 = vst [vmem:[%s1449_s3 + $0x28] sm:$0xff] %v982_v22  ;;  %vm887_vm14 = vcmask 1043456  }
 0x3fb   :  { %579 = vmatpush.msrb.mxu0 %v558_v48  ;;  %v546_v24 = vmul.f32 %v515_v23, %v1276_v54  ;;  %v727_v54 = vsel %vm710_vm15, %v718_v34, %v726_v25  ;;  %v813_v34 = vsel %vm812_vm2, %v1128_v5, 0.0  ;;  %vm883_vm15 = vcmask 326656  }
 0x3fd   :  { %580 = vmatpush.msrb.mxu0 %v1294_v26  ;;  %v551_v30 = vmul.f32 %v1285_v12, %v546_v24 }
 0x3ff   :  { %v556_v31 = vadd.f32 %v1289_v19, %v551_v30 }
 0x401   :  { %581 = vmatpush.msrb.mxu0 %v556_v31  ;;  %v979_v35 = vsel %vm107_vm7, %v556_v31, 0.0 }
 0x402   :  { %983 = vst [vmem:[%s1449_s3 + $0x10] sm:$0xff] %v979_v35  ;;  %1016 = vmatmul.msk.f32.vlgmr.msrb.gmra.mxu0 %vm367_vm10, %v1134_v7  ;;  %v33_v7 = vld [vmem:[%s1448_s2 + $0x50] sm:$0xff] }
 0x403   :  { %748 = vmatpush.bf16.msra.mxu0 %v736_v33  ;;  %v809_v33 = vsel %vm808_vm1, %v1256_v32, 0.0 }
 0x407   :  { %749 = vmatpush.bf16.msra.mxu0 %v727_v54 }
 0x40a   :  { %1017 = vmatmul.msk.f32.gmra.mxu0 %vm367_vm10, %v1139_v9  ;;  %v34_v9 = vld [vmem:[%s1448_s2 + $0x58] sm:$0xff] }
 0x40b   :  { %859 = vmatpush.msrb.mxu0 %v559_v11 }
 0x40d   :  { %860 = vmatpush.msrb.mxu0 %v558_v48 }
 0x40f   :  { %861 = vmatpush.msrb.mxu0 %v1294_v26  ;;  %v672_v26 = vpack.c.bf16 %v34_v9, %v33_v7 }
 0x411   :  { %862 = vmatpush.msrb.mxu0 %v556_v31  ;;  %v680_v2 = vrot.slane %v672_v26, 2 }
 0x413   :  { %v683_v45 = vsel %vm678_vm0, %v680_v2, %v682_v42  ;;  %v681_v44 = vsel %vm678_vm0, %v679_v47, %v680_v2  ;;  %v802_v42 = vperm.slane %v1312_v43, 6  ;;  %v805_v47 = vperm.slane %v1312_v43, 7 }
 0x414   :  { %695 = vmatpush.bf16.msrb.mxu3 %v683_v45 }
 0x418   :  { %696 = vmatpush.bf16.msrb.mxu3 %v681_v44 }
 0x47f   :  { %v583_v12 = vpop.f32.mrf.mxu0 }
 0x487   :  { %v586_v19 = vpop.f32.mrf.mxu0 }
 0x488   :  { %v1063_v37 = vpack.i.bf16 %v586_v19, %v583_v12 }
 0x48a   :  { %1064 = vrot.lane.b32.xlu2 %v1063_v37, %s1096_s25 }
 0x492   :  { %1069 = vrot.lane.b32.xlu2 %v1068_v1, %s1095_s24 }
 0x4e4   :  { %v1065_v48 = vpop.permute.xlu2 %1064 }
 0x4e5   :  { %v1067_v50 = vunpack.i.h.bf16 %v1065_v48  ;;  %v1066_v51 = vunpack.i.l.bf16 %v1065_v48 }
 0x4e7   :  { %v667_v57 = vsel %vm348_vm8, %v1156_v14, %v1067_v50  ;;  %v666_v58 = vsel %vm348_vm8, %v1163_v15, %v1066_v51  ;;  %v709_v14 = vperm.slane %v1312_v43, 5 }
 0x4ec   :  { %v1070_v52 = vpop.permute.xlu2 %1069 }
 0x4ed   :  { %v1072_v53 = vunpack.i.h.bf16 %v1070_v52  ;;  %v1071_v56 = vunpack.i.l.bf16 %v1070_v52 }
 0x4ef   :  { %v668_v59 = vsel %vm357_vm9, %v666_v58, %v1071_v56  ;;  %v669_v36 = vsel %vm357_vm9, %v667_v57, %v1072_v53 }
 0x4f0   :  { %v670_v60 = vpack.c.bf16 %v669_v36, %v668_v59 }
 0x4f2   :  { %1021 = vmatmul.msk.bf16.vlgmr.msrb.gmra.mxu3 %vm367_vm10, %v670_v60 }
 0x575   :  { %v698_v61 = vpop.f32.mrf.mxu3 }
 0x576   :  { %v699_v63 = vadd.f32 %v698_v61, %v674_v62 }
 0x578   :  { %v703_v6 = vmax.f32 %v699_v63, 0.0 }
 0x57d   :  { %v700_v0 = vpop.f32.mrf.mxu3 }
 0x57e   :  { %v701_v3 = vadd.f32 %v700_v0, %v674_v62 }
 0x580   :  { %v704_v8 = vmax.f32 %v701_v3, 0.0  ;;  %v44_v3 = vld [vmem:[%s1448_s2 + $0xa8] sm:$0xff] }
 0x582   :  { %v705_v10 = vpack.c.bf16 %v704_v8, %v703_v6  ;;  %v881_v6 = vpack.c.bf16 %v44_v3, %v44_v3  ;;  %v42_v8 = vld [vmem:[%s1448_s2 + $0x98] sm:$0xff] }
 0x584   :  { %1022 = vmatmul.msk.bf16.vlgmr.msra.gmra.mxu0 %vm367_vm10, %v705_v10  ;;  %v889_v10 = vsel %vm887_vm14, %v881_v6, 0 }
 0x594   :  { %1024 = vmatmul.msk.f32.vlgmr.msrb.gmra.mxu0 %vm367_vm10, %v1128_v5 }
 0x601   :  { %v751_v15 = vpop.f32.mrf.mxu0 }
 0x602   :  { %v752_v11 = vadd.f32 %v751_v15, %v709_v14 }
 0x604   :  { %v756_v16 = vmax.f32 %v752_v11, 0.0 }
 0x606   :  { %v758_v17 = vsel %vm107_vm7, %v756_v16, 0.0 }
 0x607   :  { %759 = vadd.xlane.f32.xlu1 %v758_v17 }
 0x609   :  { %v753_v55 = vpop.f32.mrf.mxu0 }
 0x60a   :  { %v754_v18 = vadd.f32 %v753_v55, %v709_v14  ;;  %v40_v55 = vld [vmem:[%s1448_s2 + $0x88] sm:$0xff] }
 0x60c   :  { %v757_v20 = vmax.f32 %v754_v18, 0.0  ;;  %v41_v18 = vld [vmem:[%s1448_s2 + $0x90] sm:$0xff] }
 0x60e   :  { %v761_v21 = vsel %vm107_vm7, %v757_v20, 0.0 }
 0x60f   :  { %762 = vadd.xlane.f32.xlu2 %v761_v21 }
 0x611   :  { %v864_v62 = vpop.f32.mrf.mxu0 }
 0x67a   :  { %v760_v49 = vpop.xlane.xlu1 %759 }
 0x67b   :  { %v764_v24 = vmul.f32 %v760_v49, %v1259_v39 }
 0x67d   :  { %v766_v28 = vsub.f32 %v756_v16, %v764_v24 }
 0x67f   :  { %v768_v30 = vmul.f32 %v766_v28, %v766_v28 }
 0x681   :  { %v770_v31 = vsel %vm107_vm7, %v768_v30, 0.0  ;;  %v49_v30 = vld [vmem:[%s1448_s2 + $0xd0] sm:$0xf] }
 0x682   :  { %v763_v22 = vpop.xlane.xlu2 %762  ;;  %v971_v6 = vperm.slane %v49_v30, 2 }
 0x683   :  { %v765_v23 = vmul.f32 %v763_v22, %v1259_v39 }
 0x685   :  { %v767_v25 = vsub.f32 %v757_v20, %v765_v23  ;;  %v879_v20 = vpack.c.bf16 %v41_v18, %v40_v55 }
 0x687   :  { %v769_v27 = vmul.f32 %v767_v25, %v767_v25 }
 0x689   :  { %v773_v29 = vsel %vm107_vm7, %v769_v27, 0.0  ;;  %v48_v27 = vld [vmem:[%s1448_s2 + $0xc8] sm:$0xff] }
 0x68a   :  { %774 = vadd.xlane.f32.xlu0 %v773_v29  ;;  %v45_v29 = vld [vmem:[%s1448_s2 + $0xb0] sm:$0xff] }
 0x692   :  { %771 = vadd.xlane.f32.xlu0 %v770_v31  ;;  %v908_v31 = vpack.c.bf16 %v49_v30, %v49_v30 }
 0x69a   :  { %810 = vadd.xlane.f32.xlu0 %v809_v33 }
 0x6a2   :  { %814 = vadd.xlane.f32.xlu0 %v813_v34 }
 0x6fd   :  { %v775_v35 = vpop.xlane.xlu0 %774 }
 0x6fe   :  { %v777_v54 = vmul.f32 %v775_v35, %v1259_v39 }
 0x700   :  { %v779_v12 = vadd.f32 1e-05, %v777_v54 }
 0x702   :  { %1083 = vrsqrt.f32 %v779_v12  ;;  %vm796_vm4 = vweird.f32 %v779_v12 }
 0x705   :  { %v772_v19 = vpop.xlane.xlu0 %771 }
 0x706   :  { %v776_v37 = vmul.f32 %v772_v19, %v1259_v39 }
 0x708   :  { %v1084_v38 = vpop.eup %1083  ;;  %v778_v40 = vadd.f32 1e-05, %v776_v37 }
 0x709   :  { %v791_v1 = vmul.f32 %v1084_v38, %v779_v12  ;;  %vm797_vm3 = vweird.f32 %v1084_v38  ;;  %v926_v12 = vshll.u32 %v908_v31, 16 }
 0x70a   :  { %1085 = vrsqrt.f32 %v778_v40  ;;  %vm798_vm5 = vmor %vm796_vm4, %vm797_vm3  ;;  %vm786_vm12 = vweird.f32 %v778_v40 }
 0x70b   :  { %v792_v7 = vmul.f32 %v1084_v38, %v791_v1 }
 0x70d   :  { %v793_v9 = vmul.f32 0.5, %v792_v7  ;;  %v811_v36 = vpop.xlane.xlu0 %810 }
 0x70e   :  { %v816_v15 = vmax.f32 %v811_v36, 1.0 }
 0x70f   :  { %v794_v26 = vsub.f32 1.5, %v793_v9 }
 0x710   :  { %v1086_v41 = vpop.eup %1085 }
 0x711   :  { %v795_v2 = vmul.f32 %v1084_v38, %v794_v26  ;;  %v781_v5 = vmul.f32 %v1086_v41, %v778_v40  ;;  %vm787_vm6 = vweird.f32 %v1086_v41 }
 0x712   :  { %vm788_vm13 = vmor %vm786_vm12, %vm787_vm6 }
 0x713   :  { %v799_v4 = vsel %vm798_vm5, %v1084_v38, %v795_v2  ;;  %v782_v45 = vmul.f32 %v1086_v41, %v781_v5  ;;  %v928_v38 = vrot.slane %v926_v12, 1 }
 0x714   :  { %v801_v46 = vmul.f32 %v799_v4, %v767_v25  ;;  %v47_v25 = vld [vmem:[%s1448_s2 + $0xc0] sm:$0xff] }
 0x715   :  { %v783_v44 = vmul.f32 0.5, %v782_v45  ;;  %v815_v60 = vpop.xlane.xlu0 %814 }
 0x716   :  { %v804_v48 = vmul.f32 %v802_v42, %v801_v46  ;;  %v818_v61 = vmax.f32 %v815_v60, 1.0  ;;  %v909_v46 = vperm.slane %v49_v30, 1 }
 0x717   :  { %v784_v50 = vsub.f32 1.5, %v783_v44 }
 0x718   :  { %v807_v51 = vadd.f32 %v805_v47, %v804_v48  ;;  %1087 = vrcp.f32 %v818_v61 }
 0x719   :  { %v785_v52 = vmul.f32 %v1086_v41, %v784_v50  ;;  %1089 = vrcp.f32 %v816_v15 }
 0x71a   :  { %837 = vmatpush.msra.mxu1 %v807_v51  ;;  %v976_v53 = vsel %vm107_vm7, %v807_v51, 0.0 }
 0x71b   :  { %v789_v56 = vsel %vm788_vm13, %v1086_v41, %v785_v52  ;;  %978 = vst [vmem:[%s1449_s3 + $0x8] sm:$0xff] %v976_v53  ;;  %v882_v41 = vperm.slane %v45_v29, 0 }
 0x71c   :  { %v800_v57 = vmul.f32 %v789_v56, %v766_v28  ;;  %v907_v28 = vpack.c.bf16 %v48_v27, %v47_v25 }
 0x71e   :  { %v803_v58 = vmul.f32 %v802_v42, %v800_v57  ;;  %v1088_v63 = vpop.eup %1087  ;;  %v918_v33 = vshll.u32 %v907_v28, 16  ;;  %v922_v54 = vshrl.u32 %v907_v28, 16 }
 0x71f   :  { %v867_v0 = vmul.f32 %v1088_v63, %v864_v62  ;;  %v1090_v11 = vpop.eup %1089 }
 0x720   :  { %v806_v59 = vadd.f32 %v805_v47, %v803_v58  ;;  %v920_v35 = vrot.slane %v918_v33, 1 }
 0x721   :  { %873 = vrot.lane.b32.xlu0 %v867_v0, %s1095_s24 }
 0x722   :  { %838 = vmatpush.msra.mxu1 %v806_v59  ;;  %v975_v43 = vsel %vm107_vm7, %v806_v59, 0.0  ;;  %v924_v37 = vor.u32 %v922_v54, %v920_v35 }
 0x723   :  { %977 = vst [vmem:[%s1449_s3] sm:$0xff] %v975_v43  ;;  %1023 = vmatmul.msk.f32.vlgmr.msra.gmra.mxu1 %vm107_vm7, %v1256_v32  ;;  %v43_v32 = vld [vmem:[%s1448_s2 + $0xa0] sm:$0xff] }
 0x724   :  { %896 = vmatpush.bf16.msrb.mxu1 %v889_v10  ;;  %v880_v14 = vpack.c.bf16 %v43_v32, %v42_v8  ;;  %v929_v7 = vsel %vm403_vm11, %v924_v37, %v928_v38  ;;  %v973_v32 = vperm.slane %v49_v30, 3 }
 0x725   :  { %941 = vmatpush.bf16.msra.mxu3 %v929_v7 }
 0x728   :  { %897 = vmatpush.bf16.msrb.mxu1 %v880_v14 }
 0x72c   :  { %898 = vmatpush.bf16.msrb.mxu1 %v879_v20 }
 0x793   :  { %v874_v21 = vpop.permute.xlu0 %873 }
 0x7a0   :  { %v840_v16 = vpop.f32.mrf.mxu1 }
 0x7a1   :  { %v843_v17 = vmul.f32 %v1090_v11, %v840_v16 }
 0x7a3   :  { %869 = vrot.lane.b32.xlu2 %v843_v17, %s1096_s25 }
 0x7fd   :  { %v870_v49 = vpop.permute.xlu2 %869 }
 0x7fe   :  { %v876_v22 = vsel %vm348_vm8, %v1149_v13, %v870_v49  ;;  %v46_v13 = vld [vmem:[%s1448_s2 + $0xb8] sm:$0xff] }
 0x7ff   :  { %v877_v23 = vsel %vm357_vm9, %v876_v22, %v874_v21  ;;  %v906_v34 = vpack.c.bf16 %v46_v13, %v45_v29 }
 0x800   :  { %v878_v24 = vpack.c.bf16 %v877_v23, %v877_v23 }
 0x801   :  { %v913_v19 = vshll.u32 %v906_v34, 16  ;;  %v911_v40 = vshrl.u32 %v906_v34, 16 }
 0x802   :  { %1025 = vmatmul.msk.bf16.vlgmr.msrb.gmra.mxu1 %vm883_vm15, %v878_v24 }
 0x803   :  { %v915_v1 = vrot.slane %v913_v19, 1 }
 0x805   :  { %v916_v9 = vor.u32 %v915_v1, %v911_v40 }
 0x807   :  { %v921_v26 = vsel %vm403_vm11, %v916_v9, %v920_v35 }
 0x808   :  { %942 = vmatpush.bf16.msra.mxu3 %v921_v26 }
 0x87f   :  { %v900_v2 = vpop.f32.mrf.mxu1 }
 0x880   :  { %v901_v5 = vadd.f32 %v900_v2, %v882_v41 }
 0x882   :  { %v904_v42 = vmax.f32 %v901_v5, 0.0 }
 0x884   :  { %v905_v4 = vpack.c.bf16 %v904_v42, %v904_v42 }
 0x886   :  { %1026 = vmatmul.msk.bf16.vlgmr.msra.gmra.mxu3 %vm367_vm10, %v905_v4 }
 0x887   :  { %v902_v45 = vpop.f32.mrf.mxu1 }
 0x909   :  { %v944_v47 = vpop.f32.mrf.mxu3 }
 0x90a   :  { %v945_v44 = vadd.f32 %v944_v47, %v909_v46 }
 0x90c   :  { %v948_v48 = vmax.f32 %v945_v44, 0.0 }
 0x90e   :  { %v949_v50 = vsel %vm808_vm1, %v948_v48, 0.0 }
 0x90f   :  { %950 = vadd.xlane.f32.xlu2 %v949_v50 }
 0x911   :  { %v946_v51 = vpop.f32.mrf.mxu3 }
 0x982   :  { %v951_v52 = vpop.xlane.xlu2 %950 }
 0x983   :  { %v952_v53 = vmul.f32 %v951_v52, %v1259_v39 }
 0x985   :  { %v953_v56 = vsub.f32 %v948_v48, %v952_v53 }
 0x987   :  { %v954_v57 = vmul.f32 %v953_v56, %v953_v56 }
 0x989   :  { %v955_v58 = vsel %vm808_vm1, %v954_v57, 0.0 }
 0x98a   :  { %956 = vadd.xlane.f32.xlu0 %v955_v58 }
 0x9fd   :  { %v957_v59 = vpop.xlane.xlu0 %956 }
 0x9fe   :  { %v958_v43 = vmul.f32 %v957_v59, %v1259_v39 }
 0xa00   :  { %v959_v36 = vadd.f32 1e-05, %v958_v43 }
 0xa02   :  { %1091 = vrsqrt.f32 %v959_v36  ;;  %vm966_vm9 = vweird.f32 %v959_v36 }
 0xa08   :  { %v1092_v60 = vpop.eup %1091 }
 0xa09   :  { %v961_v61 = vmul.f32 %v1092_v60, %v959_v36  ;;  %vm967_vm8 = vweird.f32 %v1092_v60 }
 0xa0a   :  { %vm968_vm10 = vmor %vm966_vm9, %vm967_vm8 }
 0xa0b   :  { %v962_v62 = vmul.f32 %v1092_v60, %v961_v61 }
 0xa0d   :  { %v963_v63 = vmul.f32 0.5, %v962_v62 }
 0xa0f   :  { %v964_v0 = vsub.f32 1.5, %v963_v63 }
 0xa11   :  { %v965_v3 = vmul.f32 %v1092_v60, %v964_v0 }
 0xa13   :  { %v969_v8 = vsel %vm968_vm10, %v1092_v60, %v965_v3 }
 0xa14   :  { %v970_v10 = vmul.f32 %v969_v8, %v953_v56 }
 0xa16   :  { %v972_v14 = vmul.f32 %v971_v6, %v970_v10 }
 0xa18   :  { %v974_v15 = vadd.f32 %v973_v32, %v972_v14 }
 0xa1a   :  { %v987_v11 = vsel %vm107_vm7, %v974_v15, 0.0 }
 0xa1b   :  { %988 = vst [vmem:[%s1449_s3 + $0x30] sm:$0x3] %v987_v11 }

</bundles_post_ra>
